<compile_context>
chip_gen: v6e
topology: v6e:2x2x1
jax: 0.10.0
libtpu: 0.0.40
codegen_flags: <defaults>
</compile_context>

<pallas_src>
import jax
import jax.numpy as jnp
from jax import lax
from jax.experimental import pallas as pl
from jax.experimental.pallas import tpu as pltpu


def _round_up(n, m):
    return ((n + m - 1) // m) * m


def value_mlp_kernel(x_ref, w1t_ref, b1_ref, w2t_ref, b2_ref, o_ref):
    # Layer 1, feature-major on the MXU: contract the minor (K) dims of both
    # operands (exactly the q @ k.T flash-attention pattern), producing the
    # hidden activations directly as (HP, TB). No XLU transpose of x or h.
    h = lax.dot_general(
        w1t_ref[...], x_ref[...],
        dimension_numbers=(((1,), (1,)), ((), ())),
        preferred_element_type=jnp.float32)                    # (HP, TB)
    h = jnp.maximum(h + b1_ref[...], 0.0)                      # bias column + ReLU (VPU)
    # Layer 2: (1, HP) @ (HP, TB) -> (1, TB); lane-dense output block, unmasked
    # stores for all interior tiles (last ragged tile is edge-masked by Pallas).
    o_ref[...] = (jnp.dot(w2t_ref[...], h, preferred_element_type=jnp.float32)
                  + b2_ref[...])


def prepare_value_params(w1, b1, w2, b2):
    """Pad hidden 10 -> 128 and pre-transpose ONCE at init time (hoisted out of
    the per-call path). Zero padding is numerically exact.

    Inputs are in (in, out) layout (transpose of PyTorch's Linear.weight):
      w1: (state_dim, 10), b1: (10,), w2: (10, 1), b2: (1,)
    Returns kernel-ready tensors:
      w1t: (128, state_dim), b1: (128, 1), w2t: (1, 128), b2: (1, 1)
    """
    K, H = w1.shape
    HP = _round_up(H, 128)
    w1t = jnp.pad(jnp.asarray(w1, jnp.float32).T, ((0, HP - H), (0, 0)))
    b1c = jnp.pad(jnp.asarray(b1, jnp.float32).reshape(H, 1), ((0, HP - H), (0, 0)))
    w2t = jnp.pad(jnp.asarray(w2, jnp.float32).reshape(H, 1).T, ((0, 0), (0, HP - H)))
    b2s = jnp.asarray(b2, jnp.float32).reshape(1, 1)
    return w1t, b1c, w2t, b2s


def value_forward(x, params, *, tile_b=8192):
    """x: (B, state_dim) f32 (batch-major, PyTorch layout); params from
    prepare_value_params().  Returns (B, 1) f32, matching Value.forward."""
    w1t_p, b1_p, w2t_p, b2_p = params
    B, K = x.shape
    HP, Kw = w1t_p.shape
    assert Kw == K, "state_dim mismatch between x and prepared params"

    # Batch tile: multiple of 128 (lane-dense output blocks), large by default
    # so the ~600-cycle/step pipeline overhead is amortised; capped for tiny B.
    # (On v7x an even tile count splits best across the two TensorCores.)
    TB = min(_round_up(tile_b, 128), _round_up(B, 128))
    grid = (pl.cdiv(B, TB),)  # ragged last tile handled by Pallas edge masking

    out = pl.pallas_call(
        value_mlp_kernel,
        out_shape=jax.ShapeDtypeStruct((1, B), jnp.float32),
        grid_spec=pltpu.PrefetchScalarGridSpec(
            num_scalar_prefetch=0,
            grid=grid,
            in_specs=[
                pl.BlockSpec((TB, K), lambda i: (i, 0)),   # x streamed, double-buffered
                pl.BlockSpec((HP, K), lambda i: (0, 0)),   # weights stay VMEM-resident
                pl.BlockSpec((HP, 1), lambda i: (0, 0)),
                pl.BlockSpec((1, HP), lambda i: (0, 0)),
                pl.BlockSpec((1, 1), lambda i: (0, 0)),
            ],
            out_specs=pl.BlockSpec((1, TB), lambda i: (0, i)),
        ),
        compiler_params=pltpu.CompilerParams(
            # Independent batch tiles: shard across both TensorCores on v7x.
            dimension_semantics=("parallel",),
            # ~13-17 MiB live at TB=8192 (lane-padded x double-buffer + h temp);
            # raise past v5e's 16 MiB scoped default, keep headroom under v7x's
            # 64 MiB/TC physical VMEM.
            vmem_limit_bytes=40 * 1024 * 1024,
        ),
    )(x.astype(jnp.float32), w1t_p, b1_p, w2t_p, b2_p)

    # (1, B) -> (B, 1): pure layout plumbing. Out-of-bounds columns of the last
    # tile were never written, so `out` holds exactly B valid values.
    return out.reshape(B, 1)


def xavier_normal(key, fan_in, fan_out):
    # torch.nn.init.xavier_normal_: std = sqrt(2 / (fan_in + fan_out))
    std = (2.0 / (fan_in + fan_out)) ** 0.5
    # stored as (in, out) = transpose of torch's (out, in) weight layout
    return std * jax.random.normal(key, (fan_in, fan_out), dtype=jnp.float32)


if __name__ == "__main__":
    state_dim = 16
    hidden = 10

    key = jax.random.PRNGKey(0)
    kx, k1, k2, kx2, kx3 = jax.random.split(key, 5)

    w1 = xavier_normal(k1, state_dim, hidden)        # (state_dim, 10)
    b1 = jnp.zeros((hidden,), dtype=jnp.float32)     # constant_(bias, 0)
    w2 = xavier_normal(k2, hidden, 1)                # (10, 1)
    b2 = jnp.zeros((1,), dtype=jnp.float32)

    # Pad / transpose params once (outside the per-call / TRPO inner-loop path).
    params = prepare_value_params(w1, b1, w2, b2)

    def ref_fn(xv):
        return jnp.maximum(xv @ w1 + b1[None, :], 0.0) @ w2 + b2[None, :]

    # Small shape consistent with the module's forward (batch=2).
    x_small = jax.random.normal(kx, (2, state_dim), dtype=jnp.float32)
    out_small = jax.block_until_ready(value_forward(x_small, params))
    assert out_small.shape == (2, 1)
    assert jnp.allclose(out_small, ref_fn(x_small), atol=1e-5, rtol=1e-5)

    # Non-tile-divisible batch: multi-step grid with a ragged, edge-masked tile.
    x_mid = jax.random.normal(kx2, (300, state_dim), dtype=jnp.float32)
    out_mid = jax.block_until_ready(value_forward(x_mid, params, tile_b=128))
    assert out_mid.shape == (300, 1)
    assert jnp.allclose(out_mid, ref_fn(x_mid), atol=1e-5, rtol=1e-5)

    # Large batch on the default big tile (amortised step-overhead path).
    x_big = jax.random.normal(kx3, (20000, state_dim), dtype=jnp.float32)
    out_big = jax.block_until_ready(value_forward(x_big, params))
    assert out_big.shape == (20000, 1)
    assert jnp.allclose(out_big, ref_fn(x_big), atol=1e-5, rtol=1e-5)

    print("KERNEL_OK")
</pallas_src>

<mosaic_0001>
module attributes {stable_mosaic.version = 11 : i64} {
  func.func @value_mlp_kernel(%arg0: i32, %arg1: memref<128x16xf32, #tpu.memory_space<vmem>>, %arg2: memref<128x16xf32, #tpu.memory_space<vmem>>, %arg3: memref<128x1xf32, #tpu.memory_space<vmem>>, %arg4: memref<1x128xf32, #tpu.memory_space<vmem>>, %arg5: memref<1x1xf32, #tpu.memory_space<vmem>>, %arg6: memref<1x128xf32, #tpu.memory_space<vmem>>) attributes {dimension_semantics = [#tpu.dimension_semantics<parallel>], iteration_bounds = array<i64: 1>, scalar_prefetch = 0 : i64, scratch_operands = 0 : i64, tpu.core_type = #tpu.core_type<tc>, window_params = [{transform_indices = @transform_0, window_bounds = array<i64: 128, 16>}, {pipeline_mode = #tpu.pipeline_mode<synchronous>, transform_indices = @transform_1, window_bounds = array<i64: 128, 16>}, {pipeline_mode = #tpu.pipeline_mode<synchronous>, transform_indices = @transform_2, window_bounds = array<i64: 128, 1>}, {pipeline_mode = #tpu.pipeline_mode<synchronous>, transform_indices = @transform_3, window_bounds = array<i64: 1, 128>}, {pipeline_mode = #tpu.pipeline_mode<synchronous>, transform_indices = @transform_4, window_bounds = array<i64: 1, 1>}, {transform_indices = @transform_5, window_bounds = array<i64: 1, 128>}]} {
    %c0 = arith.constant 0 : index
    %c0_0 = arith.constant 0 : index
    %0 = vector.load %arg2[%c0, %c0_0] : memref<128x16xf32, #tpu.memory_space<vmem>>, vector<128x16xf32>
    %c0_1 = arith.constant 0 : index
    %c0_2 = arith.constant 0 : index
    %1 = vector.load %arg1[%c0_1, %c0_2] : memref<128x16xf32, #tpu.memory_space<vmem>>, vector<128x16xf32>
    %cst = arith.constant dense<0.000000e+00> : vector<128x128xf32>
    %2 = tpu.matmul %0, %1, %cst {dimension_numbers = #tpu.dot_dimension_numbers<[1], [1], [0], [0], [0, 0, 1, 0], [], []>} : vector<128x16xf32>, vector<128x16xf32>, vector<128x128xf32> -> vector<128x128xf32>
    %c0_3 = arith.constant 0 : index
    %c0_4 = arith.constant 0 : index
    %3 = vector.load %arg3[%c0_3, %c0_4] : memref<128x1xf32, #tpu.memory_space<vmem>>, vector<128x1xf32>
    %4 = vector.broadcast %3 : vector<128x1xf32> to vector<128x128xf32>
    %5 = arith.addf %2, %4 : vector<128x128xf32>
    %cst_5 = arith.constant 0.000000e+00 : f32
    %6 = vector.broadcast %cst_5 : f32 to vector<128x128xf32>
    %7 = arith.maximumf %5, %6 : vector<128x128xf32>
    %c0_6 = arith.constant 0 : index
    %c0_7 = arith.constant 0 : index
    %8 = vector.load %arg4[%c0_6, %c0_7] : memref<1x128xf32, #tpu.memory_space<vmem>>, vector<1x128xf32>
    %cst_8 = arith.constant dense<0.000000e+00> : vector<1x128xf32>
    %9 = tpu.matmul %8, %7, %cst_8 {dimension_numbers = #tpu.dot_dimension_numbers<[1], [0], [0], [1], [0, 0, 1, 1], [], []>} : vector<1x128xf32>, vector<128x128xf32>, vector<1x128xf32> -> vector<1x128xf32>
    %c0_9 = arith.constant 0 : index
    %c0_10 = arith.constant 0 : index
    %10 = vector.load %arg5[%c0_9, %c0_10] : memref<1x1xf32, #tpu.memory_space<vmem>>, vector<1x1xf32>
    %11 = vector.broadcast %10 : vector<1x1xf32> to vector<1x128xf32>
    %12 = arith.addf %9, %11 : vector<1x128xf32>
    %c0_11 = arith.constant 0 : index
    %c0_12 = arith.constant 0 : index
    %13 = vector.load %arg6[%c0_11, %c0_12] : memref<1x128xf32, #tpu.memory_space<vmem>>, vector<1x128xf32>
    tpu.vector_store %arg6[%c0_11, %c0_12], %12 {strides = array<i32>} : memref<1x128xf32, #tpu.memory_space<vmem>>, vector<1x128xf32>,
    return
  }
  func.func @transform_0(%arg0: i32) -> (i32, i32) {
    %c0_i32 = arith.constant 0 : i32
    %c0_i32_0 = arith.constant 0 : i32
    return %arg0, %c0_i32 : i32, i32
  }
  func.func @transform_1(%arg0: i32) -> (i32, i32) {
    %c0_i32 = arith.constant 0 : i32
    %c0_i32_0 = arith.constant 0 : i32
    %c0_i32_1 = arith.constant 0 : i32
    return %c0_i32, %c0_i32_0 : i32, i32
  }
  func.func @transform_2(%arg0: i32) -> (i32, i32) {
    %c0_i32 = arith.constant 0 : i32
    %c0_i32_0 = arith.constant 0 : i32
    %c0_i32_1 = arith.constant 0 : i32
    return %c0_i32, %c0_i32_0 : i32, i32
  }
  func.func @transform_3(%arg0: i32) -> (i32, i32) {
    %c0_i32 = arith.constant 0 : i32
    %c0_i32_0 = arith.constant 0 : i32
    %c0_i32_1 = arith.constant 0 : i32
    return %c0_i32, %c0_i32_0 : i32, i32
  }
  func.func @transform_4(%arg0: i32) -> (i32, i32) {
    %c0_i32 = arith.constant 0 : i32
    %c0_i32_0 = arith.constant 0 : i32
    %c0_i32_1 = arith.constant 0 : i32
    return %c0_i32, %c0_i32_0 : i32, i32
  }
  func.func @transform_5(%arg0: i32) -> (i32, i32) {
    %c0_i32 = arith.constant 0 : i32
    %c0_i32_0 = arith.constant 0 : i32
    return %c0_i32, %arg0 : i32, i32
  }
}

</mosaic_0001>

<bundles_post_ra>
// kernel: tpu_custom_call.1
= control target key start
LH: loop header
LB: loop body
LE: loop exit
PB: predicated region body
PF: predicated region fallthrough
CT: control target
= control target key end

     0   :  { %s969_s0 = inlined_call_operand.vmem [shape: f32[2,16], index: 0, kind: input, shape index: {}]   ;;  %s970_s1 = inlined_call_operand.vmem [shape: f32[128,16], index: 1, kind: input, shape index: {}]   ;;  %s971_s2 = inlined_call_operand.vmem [shape: f32[128,1], index: 2, kind: input, shape index: {}]   ;;  %s972_s3 = inlined_call_operand.vmem [shape: f32[1,128], index: 3, kind: input, shape index: {}]   ;;  %s973_s4 = inlined_call_operand.<no memory space> [shape: f32[1,1], index: 4, kind: input, shape index: {}]   ;;  %s974_s5 = inlined_call_operand.hbm [shape: f32[1,2], index: 5, kind: output, shape index: {}]  }
   0x1   :  { %v10_v0 = vstv %s973_s4 }
   0x2   :  { %11 = vst [vmem:[#allocation2] sm:$0x1] %v10_v0 }
   0x3   :  { %v54_v1 = vld [vmem:[%s969_s0 + $0x78] sm:$0xff]  ;;  %vm151_vm0 = vcmask 130048   ;;  %v53_v2 = vld [vmem:[%s969_s0 + $0x70] sm:$0xff]  ;;  %v705_v3 = vmov 0   ;;  %v52_v4 = vld [vmem:[%s969_s0 + $0x68] sm:$0xff] }
   0x4   :  { %586 = vmatprep.subr.msk.mxu0 %vm151_vm0, %v54_v1  ;;  %681 = vset.pattern.permute.xlu0 %v705_v3  ;;  %v23_v5 = vld [vmem:[%s970_s1] sm:$0xff]  ;;  %v70_v7 = vld [vmem:[%s971_s2 + $0x78] sm:$0xff]  ;;  %v68_v8 = vld [vmem:[%s971_s2 + $0x68] sm:$0xff] }
   0x5   :  { %587 = vmatpush3.xpose.msk.msra.mxu0 %vm151_vm0, %v54_v1  ;;  %682 = vset.pattern.permute.xlu1 %v705_v3  ;;  %v51_v6 = vld [vmem:[%s969_s0 + $0x60] sm:$0xff]  ;;  %v50_v9 = vld [vmem:[%s969_s0 + $0x58] sm:$0xff]  ;;  %v69_v10 = vld [vmem:[%s971_s2 + $0x70] sm:$0xff] }
   0x6   :  { %588 = vmatprep.subr.msk.mxu0 %vm151_vm0, %v53_v2  ;;  %618 = vmatprep.mubr.msk.f32.mxu0 %vm151_vm0, %v23_v5  ;;  %v67_v11 = vld [vmem:[%s971_s2 + $0x60] sm:$0xff]  ;;  %v49_v12 = vld [vmem:[%s969_s0 + $0x50] sm:$0xff]  ;;  %v66_v13 = vld [vmem:[%s971_s2 + $0x58] sm:$0xff] }
   0x7   :  { %148 = vperm.xlu0 %681, %v70_v7   ;;  %138 = vperm.xlu1 %682, %v68_v8  }
   0x9   :  { %589 = vmatpush3.xpose.msk.msra.mxu0 %vm151_vm0, %v53_v2 }
   0xa   :  { %590 = vmatprep.subr.msk.mxu0 %vm151_vm0, %v52_v4 }
   0xb   :  { %143 = vperm.xlu0 %681, %v69_v10   ;;  %133 = vperm.xlu1 %682, %v67_v11  }
   0xd   :  { %591 = vmatpush3.xpose.msk.msra.mxu0 %vm151_vm0, %v52_v4 }
   0xe   :  { %592 = vmatprep.subr.msk.mxu0 %vm151_vm0, %v51_v6 }
  0x11   :  { %593 = vmatpush3.xpose.msk.msra.mxu0 %vm151_vm0, %v51_v6 }
  0x12   :  { %594 = vmatprep.subr.msk.mxu0 %vm151_vm0, %v50_v9 }
  0x13   :  { %12 = vsyncpa [#allocation4], 0  ;;  %v65_v14 = vld [vmem:[%s971_s2 + $0x50] sm:$0xff]  ;;  %128 = vperm.xlu0 %681, %v66_v13   ;;  %v48_v15 = vld [vmem:[%s969_s0 + $0x48] sm:$0xff]  ;;  %v706_v51 = vmov 0.0   ;;  %vm707_vm1 = vmmov 0  }
  0x14   :  { %123 = vperm.xlu1 %682, %v65_v14   ;;  %v64_v16 = vld [vmem:[%s971_s2 + $0x48] sm:$0xff]  ;;  %v63_v17 = vld [vmem:[%s971_s2 + $0x40] sm:$0xff]  ;;  %v62_v19 = vld [vmem:[%s971_s2 + $0x38] sm:$0xff]  ;;  %642 = vmatprep.subr.mxu1 %v706_v51  ;;  %s708_s10 = smov [#allocation3]  }
  0x15   :  { %595 = vmatpush3.xpose.msk.msra.mxu0 %vm151_vm0, %v50_v9  ;;  %v47_v18 = vld [vmem:[%s969_s0 + $0x40] sm:$0xff]  ;;  %v61_v20 = vld [vmem:[%s971_s2 + $0x30] sm:$0xff]  ;;  %v46_v21 = vld [vmem:[%s969_s0 + $0x38] sm:$0xff]  ;;  %674 = vmatprep.mubr.msk.f32.mxu1 %vm707_vm1, %v706_v51  ;;  %s497_s11 = sshll.u32 %s708_s10, 4  ;;  %s498_s11 = int_to_ptr.vmem [resolvable:$true] %s497_s11 }
  0x16   :  { %596 = vmatprep.subr.msk.mxu0 %vm151_vm0, %v49_v12  ;;  %v60_v22 = vld [vmem:[%s971_s2 + $0x28] sm:$0xff]  ;;  %v59_v23 = vld [vmem:[%s971_s2 + $0x20] sm:$0xff]  ;;  %v45_v24 = vld [vmem:[%s969_s0 + $0x30] sm:$0xff]  ;;  %s687_s12 = scalar_lea.vmem %s498_s11, 32  ;;  %p688_p1 = scmp.lt.s32.totalorder %s498_s11, %s498_s11 }
  0x17   :  { %118 = vperm.xlu0 %681, %v64_v16   ;;  %v58_v25 = vld [vmem:[%s971_s2 + $0x18] sm:$0xff]  ;;  %v57_v26 = vld [vmem:[%s971_s2 + $0x10] sm:$0xff]  ;;  %v44_v27 = vld [vmem:[%s969_s0 + $0x28] sm:$0xff] }
  0x18   :  { %113 = vperm.xlu1 %682, %v63_v17   ;;  %v56_v28 = vld [vmem:[%s971_s2 + $0x8] sm:$0xff]  ;;  %v55_v29 = vld [vmem:[%s971_s2] sm:$0xff]  ;;  %v42_v32 = vld [vmem:[%s969_s0 + $0x18] sm:$0xff] }
  0x19   :  { %597 = vmatpush3.xpose.msk.msra.mxu0 %vm151_vm0, %v49_v12  ;;  %v43_v30 = vld [vmem:[%s969_s0 + $0x20] sm:$0xff]  ;;  %v41_v33 = vld [vmem:[%s969_s0 + $0x10] sm:$0xff]  ;;  %v40_v34 = vld [vmem:[%s969_s0 + $0x8] sm:$0xff] }
  0x1a   :  { %598 = vmatprep.subr.msk.mxu0 %vm151_vm0, %v48_v15  ;;  %v410_v31 = vld [vmem:[#allocation2] sm:$0x1]  ;;  %v24_v36 = vld [vmem:[%s970_s1 + $0x8] sm:$0xff]  ;;  %v25_v37 = vld [vmem:[%s970_s1 + $0x10] sm:$0xff] }
  0x1b   :  { %108 = vperm.xlu0 %681, %v62_v19   ;;  %v39_v35 = vld [vmem:[%s969_s0] sm:$0xff]  ;;  %v26_v38 = vld [vmem:[%s970_s1 + $0x18] sm:$0xff]  ;;  %v28_v40 = vld [vmem:[%s970_s1 + $0x28] sm:$0xff]  ;;  %s683_s0 = scalar_lea.vmem %s498_s11, 16 }
  0x1c   :  { %103 = vperm.xlu1 %682, %v61_v20   ;;  %v27_v39 = vld [vmem:[%s970_s1 + $0x20] sm:$0xff]  ;;  %v29_v41 = vld [vmem:[%s970_s1 + $0x30] sm:$0xff]  ;;  %v30_v42 = vld [vmem:[%s970_s1 + $0x38] sm:$0xff]  ;;  %p684_p0 = scmp.ne.s32.totalorder %s498_s11, %s683_s0  ;;  %p689_p2 = scmp.lt.s32.totalorder %s687_s12, %s683_s0 }
  0x1d   :  { %599 = vmatpush3.xpose.msk.msra.mxu0 %vm151_vm0, %v48_v15  ;;  %v31_v43 = vld [vmem:[%s970_s1 + $0x40] sm:$0xff]  ;;  %v32_v44 = vld [vmem:[%s970_s1 + $0x48] sm:$0xff]  ;;  %v33_v45 = vld [vmem:[%s970_s1 + $0x50] sm:$0xff] }
  0x1e   :  { %600 = vmatprep.subr.msk.mxu0 %vm151_vm0, %v47_v18  ;;  %v34_v46 = vld [vmem:[%s970_s1 + $0x58] sm:$0xff]  ;;  %v35_v47 = vld [vmem:[%s970_s1 + $0x60] sm:$0xff]  ;;  %v36_v48 = vld [vmem:[%s970_s1 + $0x68] sm:$0xff]  ;;  %p690_p3 = por %p689_p2, %p688_p1 }
  0x1f   :  { %98 = vperm.xlu0 %681, %v60_v22   ;;  %v37_v49 = vld [vmem:[%s970_s1 + $0x70] sm:$0xff]  ;;  %v38_v50 = vld [vmem:[%s970_s1 + $0x78] sm:$0xff] }
  0x20   :  { %93 = vperm.xlu1 %682, %v59_v23   ;;  %p691_p4 = pnand %p690_p3, %p684_p0 }
  0x21   :  { %601 = vmatpush3.xpose.msk.msra.mxu0 %vm151_vm0, %v47_v18 }
  0x22   :  { %602 = vmatprep.subr.msk.mxu0 %vm151_vm0, %v46_v21 }
  0x23   :  { %88 = vperm.xlu0 %681, %v58_v25  }
  0x24   :  { %83 = vperm.xlu1 %682, %v57_v26  }
  0x25   :  { %603 = vmatpush3.xpose.msk.msra.mxu0 %vm151_vm0, %v46_v21 }
  0x26   :  { %604 = vmatprep.subr.msk.mxu0 %vm151_vm0, %v45_v24 }
  0x27   :  { %78 = vperm.xlu0 %681, %v56_v28  }
  0x28   :  { %73 = vperm.xlu1 %682, %v55_v29  }
  0x29   :  { %605 = vmatpush3.xpose.msk.msra.mxu0 %vm151_vm0, %v45_v24 }
  0x2a   :  { %606 = vmatprep.subr.msk.mxu0 %vm151_vm0, %v44_v27 }
  0x2b   :  { %413 = vperm.xlu0 %681, %v410_v31  }
  0x2d   :  { %607 = vmatpush3.xpose.msk.msra.mxu0 %vm151_vm0, %v44_v27 }
  0x2e   :  { %608 = vmatprep.subr.msk.mxu0 %vm151_vm0, %v43_v30 }
  0x31   :  { %609 = vmatpush3.xpose.msk.msra.mxu0 %vm151_vm0, %v43_v30 }
  0x32   :  { %610 = vmatprep.subr.msk.mxu0 %vm151_vm0, %v42_v32 }
  0x35   :  { %611 = vmatpush3.xpose.msk.msra.mxu0 %vm151_vm0, %v42_v32 }
  0x36   :  { %612 = vmatprep.subr.msk.mxu0 %vm151_vm0, %v41_v33 }
  0x39   :  { %613 = vmatpush3.xpose.msk.msra.mxu0 %vm151_vm0, %v41_v33 }
  0x3a   :  { %614 = vmatprep.subr.msk.mxu0 %vm151_vm0, %v40_v34 }
  0x3d   :  { %615 = vmatpush3.xpose.msk.msra.mxu0 %vm151_vm0, %v40_v34 }
  0x3e   :  { %616 = vmatprep.subr.msk.mxu0 %vm151_vm0, %v39_v35 }
  0x41   :  { %617 = vmatpush3.xpose.msk.msra.mxu0 %vm151_vm0, %v39_v35 }
  0x44   :  { %619 = vmatmul.mubr.msk.f32.vlgmr.msra.gmra.mxu0 %vm151_vm0, %v24_v36 }
  0x45   :  { %621 = vmatprep.mubr.msk.f32.mxu0 %vm151_vm0, %v25_v37 }
  0x48   :  { %622 = vmatmul.mubr.msk.f32.gmra.mxu0 %vm151_vm0, %v26_v38 }
  0x49   :  { %624 = vmatprep.mubr.msk.f32.mxu0 %vm151_vm0, %v27_v39 }
  0x4c   :  { %625 = vmatmul.mubr.msk.f32.gmra.mxu0 %vm151_vm0, %v28_v40 }
  0x4d   :  { %627 = vmatprep.mubr.msk.f32.mxu0 %vm151_vm0, %v29_v41 }
  0x50   :  { %628 = vmatmul.mubr.msk.f32.gmra.mxu0 %vm151_vm0, %v30_v42 }
  0x51   :  { %630 = vmatprep.mubr.msk.f32.mxu0 %vm151_vm0, %v31_v43 }
  0x54   :  { %631 = vmatmul.mubr.msk.f32.gmra.mxu0 %vm151_vm0, %v32_v44 }
  0x55   :  { %633 = vmatprep.mubr.msk.f32.mxu0 %vm151_vm0, %v33_v45 }
  0x58   :  { %634 = vmatmul.mubr.msk.f32.gmra.mxu0 %vm151_vm0, %v34_v46 }
  0x59   :  { %636 = vmatprep.mubr.msk.f32.mxu0 %vm151_vm0, %v35_v47 }
  0x5c   :  { %637 = vmatmul.mubr.msk.f32.gmra.mxu0 %vm151_vm0, %v36_v48 }
  0x5d   :  { %639 = vmatprep.mubr.msk.f32.mxu0 %vm151_vm0, %v37_v49 }
  0x60   :  { %640 = vmatmul.mubr.msk.f32.gmra.mxu0 %vm151_vm0, %v38_v50 }
  0x82   :  { %v149_v57 = vpop.permute.xlu0 %148  ;;  %v139_v59 = vpop.permute.xlu1 %138 }
  0x86   :  { %v144_v62 = vpop.permute.xlu0 %143  ;;  %v134_v0 = vpop.permute.xlu1 %133 }
  0x8e   :  { %v129_v3 = vpop.permute.xlu0 %128 }
  0x8f   :  { %v124_v5 = vpop.permute.xlu1 %123 }
  0x92   :  { %v119_v8 = vpop.permute.xlu0 %118 }
  0x93   :  { %v114_v11 = vpop.permute.xlu1 %113 }
  0x96   :  { %v109_v18 = vpop.permute.xlu0 %108 }
  0x97   :  { %v104_v21 = vpop.permute.xlu1 %103 }
  0x9a   :  { %v99_v26 = vpop.permute.xlu0 %98 }
  0x9b   :  { %v94_v29 = vpop.permute.xlu1 %93 }
  0x9e   :  { %v89_v34 = vpop.permute.xlu0 %88 }
  0x9f   :  { %v84_v37 = vpop.permute.xlu1 %83 }
  0xa2   :  { %v79_v42 = vpop.permute.xlu0 %78 }
  0xa3   :  { %v74_v45 = vpop.permute.xlu1 %73 }
 0x104   :  { %v936_v52 = vpop.f32.mrf.mxu0 }
 0x105   :  { %v320_v46 = vadd.f32 %v936_v52, %v79_v42  ;;  %v409_v52 = vld [vmem:[%s972_s3] sm:$0x1] }
 0x106   :  { %v938_v53 = vpop.f32.mrf.mxu0 }
 0x107   :  { %v315_v48 = vadd.f32 %v938_v53, %v74_v45  ;;  %v394_v50 = vmax.f32 %v320_v46, 0.0 }
 0x108   :  { %v940_v54 = vpop.f32.mrf.mxu0 }
 0x109   :  { %v330_v40 = vadd.f32 %v940_v54, %v89_v34  ;;  %v393_v54 = vmax.f32 %v315_v48, 0.0 }
 0x10a   :  { %v942_v55 = vpop.f32.mrf.mxu0 }
 0x10b   :  { %v325_v43 = vadd.f32 %v942_v55, %v84_v37  ;;  %v396_v47 = vmax.f32 %v330_v40, 0.0  ;;  %v416_v55 = vlaneseq }
 0x10c   :  { %v626_v56 = vpop.f32.mrf.mxu0 }
 0x10d   :  { %v340_v35 = vadd.f32 %v626_v56, %v99_v26  ;;  %v395_v49 = vmax.f32 %v325_v43, 0.0  ;;  %v417_v53 = vshrl.u32 %v416_v55, 7 }
 0x10e   :  { %v334_v58 = vpop.f32.mrf.mxu0 }
 0x10f   :  { %v335_v38 = vadd.f32 %v334_v58, %v94_v29  ;;  %v398_v41 = vmax.f32 %v340_v35, 0.0  ;;  %v418_v56 = vsub.s32 0, %v417_v53 }
 0x110   :  { %v629_v60 = vpop.f32.mrf.mxu0 }
 0x111   :  { %v350_v30 = vadd.f32 %v629_v60, %v109_v18  ;;  %v397_v44 = vmax.f32 %v335_v38, 0.0 }
 0x112   :  { %v344_v61 = vpop.f32.mrf.mxu0 }
 0x113   :  { %v345_v32 = vadd.f32 %v344_v61, %v104_v21  ;;  %v400_v36 = vmax.f32 %v350_v30, 0.0 }
 0x114   :  { %v632_v63 = vpop.f32.mrf.mxu0 }
 0x115   :  { %v360_v24 = vadd.f32 %v632_v63, %v119_v8  ;;  %v399_v39 = vmax.f32 %v345_v32, 0.0 }
 0x116   :  { %v354_v1 = vpop.f32.mrf.mxu0 }
 0x117   :  { %v355_v27 = vadd.f32 %v354_v1, %v114_v11  ;;  %v402_v31 = vmax.f32 %v360_v24, 0.0 }
 0x118   :  { %v635_v2 = vpop.f32.mrf.mxu0 }
 0x119   :  { %v370_v19 = vadd.f32 %v635_v2, %v129_v3  ;;  %v401_v33 = vmax.f32 %v355_v27, 0.0 }
 0x11a   :  { %v364_v4 = vpop.f32.mrf.mxu0 }
 0x11b   :  { %v365_v22 = vadd.f32 %v364_v4, %v124_v5  ;;  %v404_v25 = vmax.f32 %v370_v19, 0.0 }
 0x11c   :  { %v638_v6 = vpop.f32.mrf.mxu0 }
 0x11d   :  { %v380_v13 = vadd.f32 %v638_v6, %v139_v59  ;;  %v403_v28 = vmax.f32 %v365_v22, 0.0 }
 0x11e   :  { %v374_v7 = vpop.f32.mrf.mxu0 }
 0x11f   :  { %v375_v16 = vadd.f32 %v374_v7, %v134_v0  ;;  %v406_v20 = vmax.f32 %v380_v13, 0.0 }
 0x120   :  { %v641_v9 = vpop.f32.mrf.mxu0 }
 0x121   :  { %v390_v10 = vadd.f32 %v641_v9, %v149_v57  ;;  %v405_v23 = vmax.f32 %v375_v16, 0.0  ;;  %v414_v57 = vpop.permute.xlu0 %413 }
 0x122   :  { %v384_v12 = vpop.f32.mrf.mxu0  ;;  %v419_v58 = vrot.slane %v414_v57, %v418_v56 }
 0x123   :  { %v408_v14 = vmax.f32 %v390_v10, 0.0  ;;  %v385_v15 = vadd.f32 %v384_v12, %v144_v62 }
 0x125   :  { %v407_v17 = vmax.f32 %v385_v15, 0.0  ;;  %643 = vmatpush3.msra.mxu1 %v408_v14 }
 0x126   :  { %644 = vmatprep.subr.mxu1 %v706_v51 }
 0x127   :  { %645 = vmatpush3.msra.mxu1 %v407_v17 }
 0x128   :  { %646 = vmatprep.subr.mxu1 %v706_v51 }
 0x129   :  { %647 = vmatpush3.msra.mxu1 %v406_v20 }
 0x12a   :  { %648 = vmatprep.subr.mxu1 %v706_v51 }
 0x12b   :  { %649 = vmatpush3.msra.mxu1 %v405_v23 }
 0x12c   :  { %650 = vmatprep.subr.mxu1 %v706_v51 }
 0x12d   :  { %651 = vmatpush3.msra.mxu1 %v404_v25 }
 0x12e   :  { %652 = vmatprep.subr.mxu1 %v706_v51 }
 0x12f   :  { %653 = vmatpush3.msra.mxu1 %v403_v28 }
 0x130   :  { %654 = vmatprep.subr.mxu1 %v706_v51 }
 0x131   :  { %655 = vmatpush3.msra.mxu1 %v402_v31 }
 0x132   :  { %656 = vmatprep.subr.mxu1 %v706_v51 }
 0x133   :  { %657 = vmatpush3.msra.mxu1 %v401_v33 }
 0x134   :  { %658 = vmatprep.subr.mxu1 %v706_v51 }
 0x135   :  { %659 = vmatpush3.msra.mxu1 %v400_v36 }
 0x136   :  { %660 = vmatprep.subr.mxu1 %v706_v51 }
 0x137   :  { %661 = vmatpush3.msra.mxu1 %v399_v39 }
 0x138   :  { %662 = vmatprep.subr.mxu1 %v706_v51 }
 0x139   :  { %663 = vmatpush3.msra.mxu1 %v398_v41 }
 0x13a   :  { %664 = vmatprep.subr.mxu1 %v706_v51 }
 0x13b   :  { %665 = vmatpush3.msra.mxu1 %v397_v44 }
 0x13c   :  { %666 = vmatprep.subr.mxu1 %v706_v51 }
 0x13d   :  { %667 = vmatpush3.msra.mxu1 %v396_v47 }
 0x13e   :  { %668 = vmatprep.subr.mxu1 %v706_v51 }
 0x13f   :  { %669 = vmatpush3.msra.mxu1 %v395_v49 }
 0x140   :  { %670 = vmatprep.subr.mxu1 %v706_v51 }
 0x141   :  { %671 = vmatpush3.msra.mxu1 %v394_v50 }
 0x142   :  { %672 = vmatprep.subr.mxu1 %v706_v51 }
 0x143   :  { %673 = vmatpush3.msra.mxu1 %v393_v54 }
 0x144   :  { %675 = vmatmul.mubr.f32.vlgmr.msra.gmra.mxu1 %v409_v52 }
 0x204   :  { %v486_v59 = vpop.f32.mrf.mxu1 }
 0x205   :  { %v487_v60 = vadd.f32 %v486_v59, %v419_v58 }
 0x206   :  { %v676_v61 = vpop.f32.mrf.mxu1 }
 0x207   :  { %490 = vst [vmem:[#allocation3] sm:$0x1] %v487_v60 }
 0x208   :  { %694 = shalt.err (!%p691_p4)
}
 0x209   :  { %500 = dma.vmem_to_hbm [thread:$0]  %s498_s11, 16, %s974_s5, [#allocation4]  }
 0x20a   :  { %703 = dma.done.wait [#allocation4], 16  }
 0x20b   :  { %704 = vsyncadd [#allocation4], 4294967280 }
 0x20c   :  { %504 = vsyncpa [#allocation4], 1 }

</bundles_post_ra>
